<compile_context>
chip_gen: v6e
topology: v6e:2x2x1
jax: 0.10.0
libtpu: 0.0.40
codegen_flags: <defaults>
</compile_context>

<pallas_src>
import functools
import math

import jax
import jax.numpy as jnp
from jax.experimental import pallas as pl
from jax.experimental.pallas import tpu as pltpu


# Sublane packing factor by itemsize (f32 -> 8, bf16/f16 -> 16, int8/fp8 -> 32).
_SUBLANE = {1: 32, 2: 16, 4: 8, 8: 8}

_TARGET_BLOCK_BYTES = 4 * 1024 * 1024       # ~4 MiB per pipelined buffer
_VMEM_FLOOR = 32 * 1024 * 1024              # never below 32 MiB scoped limit
_VMEM_CEIL = 64 * 1024 * 1024               # v7x physical VMEM per TC


def _round_up(v, m):
    return ((v + m - 1) // m) * m


def _taylor_poly(x, n):
    """fn = 1 + sum_{i=1..n} x^i / i!  (Horner form for the default n=2)."""
    if n == 2:
        return 1.0 + x * (1.0 + 0.5 * x)
    fn = jnp.ones_like(x)
    x_pow = jnp.ones_like(x)
    denor = 1.0
    for i in range(1, n + 1):
        denor *= float(i)
        x_pow = x_pow * x
        fn = fn + x_pow * (1.0 / denor)
    return fn


def _taylor_softmax_kernel_3d(x_ref, o_ref, *, n):
    # Tile: (tile_b, C, tile_l); reduce over axis=1 (C), lanes = spatial L.
    x = x_ref[...].astype(jnp.float32)
    fn = _taylor_poly(x, n)
    denom = jnp.sum(fn, axis=1, keepdims=True)      # (tile_b, 1, tile_l)
    o_ref[...] = (fn / denom).astype(o_ref.dtype)   # exact f32 normalization


def _taylor_softmax_kernel_2d(x_ref, o_ref, *, n):
    # Tile: (tile_m, C); reduce over lanes (C) via XLU.
    x = x_ref[...].astype(jnp.float32)
    fn = _taylor_poly(x, n)
    denom = jnp.sum(fn, axis=-1, keepdims=True)     # (tile_m, 1)
    o_ref[...] = (fn / denom).astype(o_ref.dtype)


def _vmem_limit(block_bytes, f32_block_bytes):
    # in + out arrays, double-buffered, plus ~3 block-sized f32 intermediates
    # (x upcast, fn, pre-cast output) staged through VMEM, plus headroom.
    need = 2 * 2 * block_bytes + 3 * f32_block_bytes + (4 << 20)
    return int(min(max(need, _VMEM_FLOOR), _VMEM_CEIL))


def _choose_tiles_3d(B, C, L, itemsize, target_bytes):
    """Pick (tile_b, tile_l) for the (B, C, L) layout using *padded* sizes."""
    sub = _SUBLANE.get(itemsize, 8)
    c_pad = _round_up(C, sub)
    # Lane tile: multiple of 128, or the full L (always legal).
    max_tl = max(128, (target_bytes // max(1, c_pad * itemsize)) // 128 * 128)
    tile_l = L if L <= max_tl else max_tl
    tl_pad = _round_up(tile_l, 128)
    # Batch tile: fill remaining budget; ragged last block handled by cdiv grid.
    tile_b = max(1, target_bytes // max(1, c_pad * tl_pad * itemsize))
    tile_b = min(B, tile_b)
    return tile_b, tile_l


def _choose_tile_2d(M, C, itemsize, target_bytes):
    """Pick tile_m for the (M, C) layout (C on lanes)."""
    sub = _SUBLANE.get(itemsize, 8)
    c_pad = _round_up(C, 128)
    row_bytes = max(1, c_pad * itemsize)
    want_m = max(sub, (target_bytes // row_bytes) // sub * sub)
    return M if M <= want_m else want_m


def taylor_softmax(x, dim=1, n=2):
    """Pallas TaylorSoftmax over axis `dim` of an arbitrary-rank float array."""
    assert n % 2 == 0
    shape = x.shape
    ndim = x.ndim
    dim = dim % ndim

    # Collapse to (B, C, L): a free reshape for contiguous arrays; no transpose.
    B = math.prod(shape[:dim]) if dim > 0 else 1
    C = shape[dim]
    L = math.prod(shape[dim + 1:]) if dim + 1 < ndim else 1

    itemsize = jnp.dtype(x.dtype).itemsize
    target_bytes = _TARGET_BLOCK_BYTES

    if L == 1:
        # Softmax over the last axis: lane-dense (M, C) layout, reduce on lanes.
        M = B
        x2 = x.reshape(M, C)
        tile_m = _choose_tile_2d(M, C, itemsize, target_bytes)
        c_pad = _round_up(C, 128)
        block_bytes = _round_up(tile_m, _SUBLANE.get(itemsize, 8)) * c_pad * itemsize
        f32_block = _round_up(tile_m, 8) * c_pad * 4
        grid = (pl.cdiv(M, tile_m),)

        out2 = pl.pallas_call(
            functools.partial(_taylor_softmax_kernel_2d, n=n),
            out_shape=jax.ShapeDtypeStruct((M, C), x.dtype),
            grid_spec=pltpu.PrefetchScalarGridSpec(
                num_scalar_prefetch=0,
                grid=grid,
                in_specs=[pl.BlockSpec((tile_m, C), lambda i: (i, 0))],
                out_specs=pl.BlockSpec((tile_m, C), lambda i: (i, 0)),
            ),
            compiler_params=pltpu.CompilerParams(
                dimension_semantics=("parallel",),
                vmem_limit_bytes=_vmem_limit(block_bytes, f32_block),
            ),
        )(x2)
        return out2.reshape(shape)

    # General path: (B, C, L) with lanes = L (spatial), reduce over C (axis=1).
    # NOTE: for 1 < L < 128 this keeps a single HBM pass but runs the in-kernel
    # vector work at L/128 lane utilization; acceptable since the kernel is
    # HBM-bound for realistic shapes.
    # TODO(synk): add a C-split path (grid axis over C marked "arbitrary" with a
    # VMEM denom accumulator + second normalize pass) for vocab-sized C where
    # even a (1, C, 128) block exceeds the VMEM budget.
    x3 = x.reshape(B, C, L)
    tile_b, tile_l = _choose_tiles_3d(B, C, L, itemsize, target_bytes)
    c_pad = _round_up(C, _SUBLANE.get(itemsize, 8))
    tl_pad = _round_up(tile_l, 128)
    block_bytes = tile_b * c_pad * tl_pad * itemsize
    f32_block = tile_b * _round_up(C, 8) * tl_pad * 4
    grid = (pl.cdiv(B, tile_b), pl.cdiv(L, tile_l))

    out3 = pl.pallas_call(
        functools.partial(_taylor_softmax_kernel_3d, n=n),
        out_shape=jax.ShapeDtypeStruct((B, C, L), x.dtype),
        grid_spec=pltpu.PrefetchScalarGridSpec(
            num_scalar_prefetch=0,
            grid=grid,
            in_specs=[pl.BlockSpec((tile_b, C, tile_l), lambda i, j: (i, 0, j))],
            out_specs=pl.BlockSpec((tile_b, C, tile_l), lambda i, j: (i, 0, j)),
        ),
        compiler_params=pltpu.CompilerParams(
            dimension_semantics=("parallel", "parallel"),
            vmem_limit_bytes=_vmem_limit(block_bytes, f32_block),
        ),
    )(x3)
    return out3.reshape(shape)


def _reference_taylor_softmax(x, dim=1, n=2):
    fn = jnp.ones_like(x)
    denor = 1.0
    for i in range(1, n + 1):
        denor *= float(i)
        fn = fn + jnp.power(x, i) / denor
    return fn / jnp.sum(fn, axis=dim, keepdims=True)


if __name__ == "__main__":
    key = jax.random.PRNGKey(0)

    # NCHW, softmax over channels (dim=1), n=2 — module defaults.
    x = jax.random.normal(key, (2, 4, 16, 16), dtype=jnp.float32)
    out = jax.block_until_ready(taylor_softmax(x, dim=1, n=2))
    ref = _reference_taylor_softmax(x, dim=1, n=2)
    assert out.shape == x.shape and out.dtype == x.dtype
    assert jnp.allclose(out, ref, atol=1e-5, rtol=1e-5)

    # n=4 path (general polynomial loop).
    out4 = jax.block_until_ready(taylor_softmax(x, dim=1, n=4))
    ref4 = _reference_taylor_softmax(x, dim=1, n=4)
    assert jnp.allclose(out4, ref4, atol=1e-5, rtol=1e-5)

    # 2-D (batch, classes) input: exercises the lane-dense small-L path.
    key2 = jax.random.PRNGKey(0)
    x2 = jax.random.normal(key2, (8, 10), dtype=jnp.float32)
    out2 = jax.block_until_ready(taylor_softmax(x2, dim=1, n=2))
    ref2 = _reference_taylor_softmax(x2, dim=1, n=2)
    assert jnp.allclose(out2, ref2, atol=1e-5, rtol=1e-5)

    print("KERNEL_OK")
</pallas_src>

<mosaic_0001>
module attributes {stable_mosaic.version = 11 : i64} {
  func.func @_taylor_softmax_kernel_3d(%arg0: i32, %arg1: i32, %arg2: memref<2x4x256xf32, #tpu.memory_space<vmem>>, %arg3: memref<2x4x256xf32, #tpu.memory_space<vmem>>) attributes {dimension_semantics = [#tpu.dimension_semantics<parallel>, #tpu.dimension_semantics<parallel>], iteration_bounds = array<i64: 1, 1>, scalar_prefetch = 0 : i64, scratch_operands = 0 : i64, tpu.core_type = #tpu.core_type<tc>, window_params = [{transform_indices = @transform_0, window_bounds = array<i64: 2, 4, 256>}, {transform_indices = @transform_1, window_bounds = array<i64: 2, 4, 256>}]} {
    %c0 = arith.constant 0 : index
    %c0_0 = arith.constant 0 : index
    %c0_1 = arith.constant 0 : index
    %0 = vector.load %arg2[%c0, %c0_0, %c0_1] : memref<2x4x256xf32, #tpu.memory_space<vmem>>, vector<2x4x256xf32>
    %cst = arith.constant 5.000000e-01 : f32
    %1 = vector.broadcast %cst : f32 to vector<2x4x256xf32>
    %2 = arith.mulf %1, %0 : vector<2x4x256xf32>
    %cst_2 = arith.constant 1.000000e+00 : f32
    %3 = vector.broadcast %cst_2 : f32 to vector<2x4x256xf32>
    %4 = arith.addf %3, %2 : vector<2x4x256xf32>
    %5 = arith.mulf %0, %4 : vector<2x4x256xf32>
    %cst_3 = arith.constant 1.000000e+00 : f32
    %6 = vector.broadcast %cst_3 : f32 to vector<2x4x256xf32>
    %7 = arith.addf %6, %5 : vector<2x4x256xf32>
    %cst_4 = arith.constant dense<0.000000e+00> : vector<2x256xf32>
    %8 = vector.multi_reduction <add>, %7, %cst_4 [1] : vector<2x4x256xf32> to vector<2x256xf32>
    %9 = vector.shape_cast %8 : vector<2x256xf32> to vector<2x1x256xf32>
    %10 = vector.broadcast %9 : vector<2x1x256xf32> to vector<2x4x256xf32>
    %11 = arith.divf %7, %10 : vector<2x4x256xf32>
    %c0_5 = arith.constant 0 : index
    %c0_6 = arith.constant 0 : index
    %c0_7 = arith.constant 0 : index
    %12 = vector.load %arg3[%c0_5, %c0_6, %c0_7] : memref<2x4x256xf32, #tpu.memory_space<vmem>>, vector<2x4x256xf32>
    tpu.vector_store %arg3[%c0_5, %c0_6, %c0_7], %11 {strides = array<i32>} : memref<2x4x256xf32, #tpu.memory_space<vmem>>, vector<2x4x256xf32>,
    return
  }
  func.func @transform_0(%arg0: i32, %arg1: i32) -> (i32, i32, i32) {
    %c0_i32 = arith.constant 0 : i32
    %c0_i32_0 = arith.constant 0 : i32
    return %arg0, %c0_i32, %arg1 : i32, i32, i32
  }
  func.func @transform_1(%arg0: i32, %arg1: i32) -> (i32, i32, i32) {
    %c0_i32 = arith.constant 0 : i32
    %c0_i32_0 = arith.constant 0 : i32
    return %arg0, %c0_i32, %arg1 : i32, i32, i32
  }
}

</mosaic_0001>

<bundles_post_ra>
// kernel: tpu_custom_call.1
= control target key start
LH: loop header
LB: loop body
LE: loop exit
PB: predicated region body
PF: predicated region fallthrough
CT: control target
= control target key end

     0   :  { %6 = vsyncpa [#allocation3], 0  ;;  %s177_s0 = inlined_call_operand.hbm [shape: f32[2,4,256], index: 0, kind: input, shape index: {}]   ;;  %s178_s1 = inlined_call_operand.hbm [shape: f32[2,4,256], index: 1, kind: output, shape index: {}]  }
   0x1   :  { %7 = vsyncpa [#allocation4], 0  ;;  %s151_s6 = smov [#allocation2]  }
   0x2   :  { %s13_s7 = sshll.u32 %s151_s6, 4  ;;  %s14_s7 = int_to_ptr.vmem [resolvable:$true] %s13_s7 }
   0x3   :  { %s115_s8 = scalar_lea.vmem %s14_s7, 256  ;;  %p120_p1 = scmp.lt.s32.totalorder %s14_s7, %s14_s7 }
   0x4   :  { %p116_p0 = scmp.ne.s32.totalorder %s14_s7, %s115_s8  ;;  %p121_p2 = scmp.lt.s32.totalorder %s115_s8, %s115_s8 }
   0x6   :  { %p122_p3 = por %p121_p2, %p120_p1 }
   0x8   :  { %p123_p4 = pnand %p122_p3, %p116_p0 }
   0xa   :  { %126 = shalt.err (!%p123_p4)
}
   0xb   :  { %s152_s9 = smov 128   ;;  %s153_s10 = smov 8  }
   0xc   :  { %19 = dma.hbm_to_vmem [thread:$0]  %s177_s0, 256, %s14_s7, [#allocation3], %s152_s9, %s152_s9, %s153_s10  }
   0xd   :  { %147 = dma.done.wait [#allocation3], 256  }
   0xe   :  { %148 = vsyncadd [#allocation3], 4294967040  ;;  %v23_v0 = vld [vmem:[#allocation2] sm:$0xff]  ;;  %v24_v1 = vld [vmem:[#allocation2 + $0x8] sm:$0xff]  ;;  %vm39_vm0 = vcmask 1043456   ;;  %s154_s0 = smov [#allocation5]  }
   0xf   :  { %v25_v2 = vmul.f32 0.5, %v23_v0  ;;  %v26_v3 = vmul.f32 0.5, %v24_v1  ;;  %s87_s13 = sshll.u32 %s154_s0, 4  ;;  %s88_s13 = int_to_ptr.vmem [resolvable:$true] %s87_s13 }
  0x10   :  { %s127_s14 = scalar_lea.vmem %s88_s13, 256  ;;  %p132_p6 = scmp.lt.s32.totalorder %s88_s13, %s88_s13 }
  0x11   :  { %v27_v4 = vadd.f32 1.0, %v25_v2  ;;  %v28_v5 = vadd.f32 1.0, %v26_v3  ;;  %p128_p5 = scmp.ne.s32.totalorder %s88_s13, %s127_s14  ;;  %p133_p7 = scmp.lt.s32.totalorder %s127_s14, %s127_s14 }
  0x13   :  { %v29_v6 = vmul.f32 %v27_v4, %v23_v0  ;;  %v30_v7 = vmul.f32 %v28_v5, %v24_v1  ;;  %p134_p8 = por %p133_p7, %p132_p6 }
  0x15   :  { %v31_v8 = vadd.f32 1.0, %v29_v6  ;;  %v32_v9 = vadd.f32 1.0, %v30_v7  ;;  %p135_p9 = pnand %p134_p8, %p128_p5 }
  0x17   :  { %v35_v10 = vcombine.high %v31_v8, %v31_v8  ;;  %v40_v11 = vsel %vm39_vm0, %v31_v8, 0.0  ;;  %v36_v12 = vcombine.high %v32_v9, %v32_v9  ;;  %v54_v13 = vsel %vm39_vm0, %v32_v9, 0.0 }
  0x18   :  { %v41_v14 = vrot.slane %v40_v11, 4  ;;  %v55_v15 = vrot.slane %v54_v13, 4 }
  0x19   :  { %v47_v16 = vsel %vm39_vm0, %v35_v10, 0.0  ;;  %v61_v17 = vsel %vm39_vm0, %v36_v12, 0.0 }
  0x1a   :  { %v42_v18 = vadd.f32 %v41_v14, %v40_v11  ;;  %v48_v19 = vrot.slane %v47_v16, 4  ;;  %v56_v20 = vadd.f32 %v55_v15, %v54_v13  ;;  %v62_v21 = vrot.slane %v61_v17, 4 }
  0x1c   :  { %v43_v22 = vrot.slane %v42_v18, 2  ;;  %v49_v23 = vadd.f32 %v48_v19, %v47_v16  ;;  %v57_v24 = vrot.slane %v56_v20, 2  ;;  %v63_v25 = vadd.f32 %v62_v21, %v61_v17 }
  0x1e   :  { %v44_v26 = vadd.f32 %v43_v22, %v42_v18  ;;  %v50_v27 = vrot.slane %v49_v23, 2  ;;  %v58_v28 = vadd.f32 %v57_v24, %v56_v20  ;;  %v64_v29 = vrot.slane %v63_v25, 2 }
  0x20   :  { %v45_v30 = vrot.slane %v44_v26, 1  ;;  %v51_v31 = vadd.f32 %v50_v27, %v49_v23  ;;  %v59_v32 = vrot.slane %v58_v28, 1  ;;  %v65_v33 = vadd.f32 %v64_v29, %v63_v25 }
  0x22   :  { %v46_v34 = vadd.f32 %v45_v30, %v44_v26  ;;  %v52_v35 = vrot.slane %v51_v31, 1  ;;  %v60_v36 = vadd.f32 %v59_v32, %v58_v28  ;;  %v66_v37 = vrot.slane %v65_v33, 1 }
  0x24   :  { %v53_v38 = vadd.f32 %v52_v35, %v51_v31  ;;  %v67_v39 = vadd.f32 %v66_v37, %v65_v33 }
  0x26   :  { %v72_v40 = vcombine.low %v46_v34, %v53_v38  ;;  %v73_v41 = vcombine.low %v60_v36, %v67_v39 }
  0x28   :  { %103 = vrcp.f32 %v72_v40 }
  0x29   :  { %105 = vrcp.f32 %v73_v41 }
  0x35   :  { %v104_v42 = vpop.eup %103 }
  0x36   :  { %v106_v43 = vpop.eup %105  ;;  %v77_v44 = vmul.f32 %v104_v42, %v31_v8 }
  0x37   :  { %v79_v45 = vmul.f32 %v106_v43, %v32_v9 }
  0x38   :  { %80 = vst [vmem:[#allocation5] sm:$0xff] %v77_v44 }
  0x39   :  { %81 = vst [vmem:[#allocation5 + $0x8] sm:$0xff] %v79_v45 }
  0x3a   :  { %138 = shalt.err (!%p135_p9)
}
  0x3b   :  { %93 = dma.vmem_to_hbm [thread:$0]  %s88_s13, 256, %s178_s1, [#allocation4], %s152_s9, %s152_s9, %s153_s10  }
  0x3c   :  { %149 = dma.done.wait [#allocation4], 256  }
  0x3d   :  { %150 = vsyncadd [#allocation4], 4294967040 }
  0x3e   :  { %97 = vsyncpa [#allocation3], 1 }
  0x3f   :  { %98 = vsyncpa [#allocation4], 1 }

</bundles_post_ra>
